<compile_context>
chip_gen: v5e
topology: v5e:2x2
jax: 0.10.0
libtpu: 0.0.40
codegen_flags: <defaults>
</compile_context>

<pallas_src>
import functools

import jax
import jax.numpy as jnp
from jax.experimental import pallas as pl
from jax.experimental.pallas import tpu as pltpu

_LANE_W = 512      # lane width of the flattened 2-D view (multiple of 128)
_MAX_ROWS = 1024   # max block rows -> 1024 * 512 * 4B = 2 MiB per f32 block
_GOLDEN = -1640531527  # 0x9E3779B9 as a signed int32 (hash/Weyl constant)


def _bits_to_f12(shape):
    """Random float32 in [1, 2): 23-bit mantissa fill under the exponent of 1.0."""
    bits = pltpu.bitcast(pltpu.prng_random_bits(shape), jnp.uint32)
    return pltpu.bitcast((bits >> 9) | jnp.uint32(0x3F800000), jnp.float32)


def _sincos_2pi_u(u01, trig_dtype):
    """(sin, cos) of theta = 2*pi*u01 for u01 in [0,1), via quadrant reduction.

    Quadrant k = round(4*u01) in {0..4}; residual r = (4*u01 - k)*(pi/2) in
    [-pi/4, pi/4] feeds short Taylor polynomials (|err| < 4e-6 in f32, plenty
    for noise); signs/swap follow from the quadrant.
    """
    v = u01 * 4.0                      # quadrant units, in [0, 4)
    k = jnp.floor(v + 0.5)             # nearest quadrant
    ki = k.astype(jnp.int32)
    r = ((v - k) * (jnp.pi / 2.0)).astype(trig_dtype)

    r2 = r * r
    sin_r = r * (1.0 + r2 * (-1.0 / 6.0
                             + r2 * (1.0 / 120.0 + r2 * (-1.0 / 5040.0))))
    cos_r = 1.0 + r2 * (-0.5 + r2 * (1.0 / 24.0 + r2 * (-1.0 / 720.0)))

    swap = (ki & 1) == 1
    sin_t = jnp.where(swap, cos_r, sin_r)
    cos_t = jnp.where(swap, sin_r, cos_r)
    sin_t = jnp.where((ki & 2) != 0, -sin_t, sin_t)
    cos_t = jnp.where(((ki + 1) & 2) != 0, -cos_t, cos_t)
    return sin_t, cos_t


def _gaussian_noise_kernel(seed_ref, x_ref, o_ref, *, sigma, half, trig_dtype):
    # Hash-mixed per-block seed -> decorrelated streams; safe for "parallel" grid.
    pltpu.prng_seed(seed_ref[0] + pl.program_id(0) * jnp.int32(_GOLDEN))
    rows = x_ref.shape[0]
    u_shape = (rows, half)

    # Radius path stays f32 (full 23-bit mantissa -> Gaussian tail to ~5.7 sigma).
    f1 = _bits_to_f12(u_shape)                          # in [1, 2)
    # log argument (2 - f1) is in (0, 1]; sigma folded into the -2 factor.
    r_mag = jnp.sqrt(jnp.log(2.0 - f1) * (-2.0 * sigma * sigma))

    # Angle path: Box-Muller uses BOTH branches (cos and sin), one per lane-half.
    u2 = _bits_to_f12(u_shape) - 1.0                    # in [0, 1)
    sin_t, cos_t = _sincos_2pi_u(u2, trig_dtype)

    z0 = (r_mag * cos_t.astype(jnp.float32)).astype(x_ref.dtype)
    z1 = (r_mag * sin_t.astype(jnp.float32)).astype(x_ref.dtype)
    o_ref[:, :half] = x_ref[:, :half] + z0
    o_ref[:, half:] = x_ref[:, half:] + z1


def _add_noise_kernel(x_ref, n_ref, o_ref):
    o_ref[...] = x_ref[...] + n_ref[...]


def _block_rows(num_rows):
    # Tiny arrays: one full-dim block (always legal). Otherwise aim for >= 2
    # grid steps (v7x megacore has 2 TensorCores), rows a multiple of 8
    # (sublane rule), capped at ~2 MiB f32 blocks so the double-buffered
    # pipeline fits every generation's scoped VMEM.
    if num_rows <= 8:
        return num_rows
    half = -(-num_rows // 2)
    half = ((half + 7) // 8) * 8
    return min(_MAX_ROWS, half)


def _trig_dtype():
    # bf16 VPU/EUP exist on v6e/v7x (2x elementwise throughput); v5e (and
    # unknown chips) keep f32 so bf16 is never emulated via converts.
    try:
        kind = jax.devices()[0].device_kind.lower()
    except Exception:
        return jnp.float32
    if ("v6" in kind) or ("v7" in kind):
        return jnp.bfloat16
    return jnp.float32


def _noise_main_tpu(x2d, seed, sigma):
    rows, width = x2d.shape
    brows = _block_rows(rows)
    grid = (pl.cdiv(rows, brows),)
    seed_arr = jnp.asarray([seed], dtype=jnp.int32)
    kernel = functools.partial(
        _gaussian_noise_kernel, sigma=float(sigma), half=width // 2,
        trig_dtype=_trig_dtype())
    return pl.pallas_call(
        kernel,
        out_shape=jax.ShapeDtypeStruct((rows, width), x2d.dtype),
        grid_spec=pltpu.PrefetchScalarGridSpec(
            num_scalar_prefetch=1,
            grid=grid,
            in_specs=[pl.BlockSpec((brows, width), lambda i, seed: (i, 0))],
            out_specs=pl.BlockSpec((brows, width), lambda i, seed: (i, 0)),
        ),
        # Inputs are (seed, x): x (flat index 1) is dead after the add, so the
        # output reuses its HBM buffer.
        input_output_aliases={1: 0},
        compiler_params=pltpu.CompilerParams(
            dimension_semantics=("parallel",),   # independent per-block streams
            vmem_limit_bytes=32 * 1024 * 1024,
        ),
    )(seed_arr, x2d)


def _noise_main_fallback(x2d, seed, sigma):
    # Non-TPU backends (interpret/CPU): the hardware PRNG has no lowering, so
    # precompute the Gaussian noise with jax.random and add it in Pallas.
    rows, width = x2d.shape
    key = jax.random.PRNGKey(seed)
    noise = (sigma * jax.random.normal(key, x2d.shape, dtype=jnp.float32)
             ).astype(x2d.dtype)
    brows = _block_rows(rows)
    grid = (pl.cdiv(rows, brows),)
    return pl.pallas_call(
        _add_noise_kernel,
        out_shape=jax.ShapeDtypeStruct((rows, width), x2d.dtype),
        grid=grid,
        in_specs=[pl.BlockSpec((brows, width), lambda i: (i, 0)),
                  pl.BlockSpec((brows, width), lambda i: (i, 0))],
        out_specs=pl.BlockSpec((brows, width), lambda i: (i, 0)),
    )(x2d, noise)


def gaussian_noise(x, seed, sigma=1.0, training=True):
    """Pallas equivalent of GaussianNoise.forward."""
    if not training:
        return x

    orig_shape = x.shape
    flat = x.reshape(-1)
    n = flat.shape[0]
    if n == 0:
        return x

    # Single pad to a 512 multiple (one coherent noise stream, no concat /
    # extra HBM passes for ragged tails), then a single output slice.
    n_pad = (-n) % _LANE_W
    if n_pad:
        flat = jnp.pad(flat, (0, n_pad))
    x2d = flat.reshape(flat.shape[0] // _LANE_W, _LANE_W)

    if jax.default_backend() == "tpu":
        out2d = _noise_main_tpu(x2d, seed, sigma)
    else:
        out2d = _noise_main_fallback(x2d, seed, sigma)

    out = out2d.reshape(-1)
    if n_pad:
        out = out[:n]
    return out.reshape(orig_shape)


if __name__ == "__main__":
    key = jax.random.PRNGKey(0)
    x = jax.random.normal(key, (2, 4, 16, 16), dtype=jnp.float32)  # NCHW

    sigma = 1.0
    out = gaussian_noise(x, seed=1234, sigma=sigma, training=True)
    out = jax.block_until_ready(out)

    # Sanity: shape/dtype preserved, noise distribution ~ N(0, sigma^2).
    assert out.shape == x.shape and out.dtype == x.dtype
    noise = (out - x).reshape(-1)
    assert abs(float(jnp.mean(noise))) < 0.15
    assert abs(float(jnp.std(noise)) - sigma) < 0.2

    # Eval mode is identity.
    out_eval = gaussian_noise(x, seed=1234, sigma=sigma, training=False)
    assert bool(jnp.all(out_eval == x))

    print("KERNEL_OK")
</pallas_src>

<mosaic_0001>
module attributes {stable_mosaic.version = 11 : i64} {
  func.func @_add_noise_kernel(%arg0: i32, %arg1: memref<4x512xf32, #tpu.memory_space<vmem>>, %arg2: memref<4x512xf32, #tpu.memory_space<vmem>>, %arg3: memref<4x512xf32, #tpu.memory_space<vmem>>) attributes {dimension_semantics = [#tpu.dimension_semantics<arbitrary>], iteration_bounds = array<i64: 1>, scalar_prefetch = 0 : i64, scratch_operands = 0 : i64, tpu.core_type = #tpu.core_type<tc>, window_params = [{transform_indices = @transform_0, window_bounds = array<i64: 4, 512>}, {transform_indices = @transform_1, window_bounds = array<i64: 4, 512>}, {transform_indices = @transform_2, window_bounds = array<i64: 4, 512>}]} {
    %c0 = arith.constant 0 : index
    %c0_0 = arith.constant 0 : index
    %0 = vector.load %arg1[%c0, %c0_0] : memref<4x512xf32, #tpu.memory_space<vmem>>, vector<4x512xf32>
    %c0_1 = arith.constant 0 : index
    %c0_2 = arith.constant 0 : index
    %1 = vector.load %arg2[%c0_1, %c0_2] : memref<4x512xf32, #tpu.memory_space<vmem>>, vector<4x512xf32>
    %2 = arith.addf %0, %1 : vector<4x512xf32>
    %c0_3 = arith.constant 0 : index
    %c0_4 = arith.constant 0 : index
    %3 = vector.load %arg3[%c0_3, %c0_4] : memref<4x512xf32, #tpu.memory_space<vmem>>, vector<4x512xf32>
    tpu.vector_store %arg3[%c0_3, %c0_4], %2 {strides = array<i32>} : memref<4x512xf32, #tpu.memory_space<vmem>>, vector<4x512xf32>,
    return
  }
  func.func @transform_0(%arg0: i32) -> (i32, i32) {
    %c0_i32 = arith.constant 0 : i32
    %c0_i32_0 = arith.constant 0 : i32
    return %arg0, %c0_i32 : i32, i32
  }
  func.func @transform_1(%arg0: i32) -> (i32, i32) {
    %c0_i32 = arith.constant 0 : i32
    %c0_i32_0 = arith.constant 0 : i32
    return %arg0, %c0_i32 : i32, i32
  }
  func.func @transform_2(%arg0: i32) -> (i32, i32) {
    %c0_i32 = arith.constant 0 : i32
    %c0_i32_0 = arith.constant 0 : i32
    return %arg0, %c0_i32 : i32, i32
  }
}

</mosaic_0001>

<bundles_post_ra>
// kernel: tpu_custom_call.1
= control target key start
LH: loop header
LB: loop body
LE: loop exit
PB: predicated region body
PF: predicated region fallthrough
CT: control target
= control target key end

     0   :  { %7 = vsyncpa [#allocation3], 0  ;;  %s174_s0 = inlined_call_operand.hbm [shape: f32[4,512], index: 0, kind: input, shape index: {}]   ;;  %s175_s1 = inlined_call_operand.hbm [shape: f32[4,512], index: 1, kind: input, shape index: {}]   ;;  %s176_s2 = inlined_call_operand.hbm [shape: f32[4,512], index: 2, kind: output, shape index: {}]  }
   0x1   :  { %8 = vsyncpa [#allocation6], 0 }
   0x2   :  { %9 = vsyncpa [#allocation4], 0  ;;  %s15_s11 = sshll.u32 %s174_s0, 4  ;;  %s147_s12 = smov [#allocation2]   ;;  %s16_s11 = int_to_ptr.hbm [resolvable:$true] %s15_s11 }
   0x3   :  { %s17_s13 = sshll.u32 %s147_s12, 4  ;;  %s26_s16 = sshll.u32 %s175_s1, 4  ;;  %s18_s13 = int_to_ptr.vmem [resolvable:$true] %s17_s13  ;;  %s27_s16 = int_to_ptr.hbm [resolvable:$true] %s26_s16 }
   0x4   :  { %20 = dma.hbm_to_vmem [thread:$0]  %s16_s11, 256, %s18_s13, [#allocation3]  }
   0x5   :  { %s148_s17 = smov [#allocation5]  }
   0x6   :  { %s28_s18 = sshll.u32 %s148_s17, 4  ;;  %s29_s18 = int_to_ptr.vmem [resolvable:$true] %s28_s18 }
   0x7   :  { %31 = dma.hbm_to_vmem [thread:$0]  %s27_s16, 256, %s29_s18, [#allocation6]  }
   0x8   :  { %141 = dma.done.wait [#allocation3], 256  }
   0x9   :  { %142 = vsyncadd [#allocation3], 4294967040 }
   0xa   :  { %143 = dma.done.wait [#allocation6], 256  }
   0xb   :  { %144 = vsyncadd [#allocation6], 4294967040  ;;  %s149_s19 = smov [#allocation7]   ;;  %s55_s22 = sshll.u32 %s176_s2, 4  ;;  %v40_v0 = vld [vmem:[#allocation2] sm:$0xff]  ;;  %v42_v1 = vld [vmem:[#allocation5] sm:$0xff]  ;;  %s56_s22 = int_to_ptr.hbm [resolvable:$true] %s55_s22 }
   0xc   :  { %s53_s0 = sshll.u32 %s149_s19, 4  ;;  %v41_v2 = vld [vmem:[#allocation2 + $0x8] sm:$0xff]  ;;  %v44_v3 = vadd.f32 %v42_v1, %v40_v0  ;;  %v43_v4 = vld [vmem:[#allocation5 + $0x8] sm:$0xff]  ;;  %s54_s0 = int_to_ptr.vmem [resolvable:$true] %s53_s0 }
   0xd   :  { %v45_v5 = vadd.f32 %v43_v4, %v41_v2 }
   0xe   :  { %46 = vst [vmem:[#allocation7] sm:$0xff] %v44_v3 }
   0xf   :  { %47 = vst [vmem:[#allocation7 + $0x8] sm:$0xff] %v45_v5 }
  0x10   :  { %58 = dma.vmem_to_hbm [thread:$0]  %s54_s0, 256, %s56_s22, [#allocation4]  }
  0x11   :  { %145 = dma.done.wait [#allocation4], 256  }
  0x12   :  { %146 = vsyncadd [#allocation4], 4294967040 }
  0x13   :  { %63 = vsyncpa [#allocation3], 1 }
  0x14   :  { %64 = vsyncpa [#allocation6], 1 }
  0x15   :  { %65 = vsyncpa [#allocation4], 1 }

</bundles_post_ra>
